<compile_context>
chip_gen: v6e
topology: v6e:2x2x1
jax: 0.10.0
libtpu: 0.0.40
codegen_flags: <defaults>
</compile_context>

<pallas_src>
import functools

import jax
import jax.numpy as jnp
from jax.experimental import pallas as pl
from jax.experimental.pallas import tpu as pltpu

BN_EPS = 1e-5
NEG_INF = -1e30  # f32-representable mask for padded class lanes


def _round_up(v, m):
    return ((v + m - 1) // m) * m


# -----------------------------------------------------------------------------
# Kernel
# -----------------------------------------------------------------------------
def gin_kernel(x_ref, adj_ref, pool_ref, w_ref, b_ref, out_ref):
    """Whole GIN forward, single block, everything VMEM resident.

    x_ref:    [Np, D]      bf16 node features (zero padded)
    adj_ref:  [Np, Np]     bf16 adjacency with self-loops already added (adj + I)
    pool_ref: [Gp, Np]     f32  mean-pool matrix
    w_ref:    [D, 5D + Cp] bf16 packed (BN-folded) weights
    b_ref:    [1, 5D + Cp] f32  packed (BN-folded) biases; padded class lanes
                               of the last layer hold -1e30 (mask folded in)
    out_ref:  [Gp, Cp]     f32  log-probabilities (padded class lanes are junk)
    """
    d = x_ref.shape[1]
    c_pad = out_ref.shape[1]

    adj = adj_ref[...]  # bf16

    def lin_relu(h_f32, layer_idx):
        off = layer_idx * d
        w = w_ref[:, pl.ds(off, d)]          # bf16
        b = b_ref[:, pl.ds(off, d)]          # f32
        y = jnp.dot(h_f32.astype(jnp.bfloat16), w,
                    preferred_element_type=jnp.float32) + b
        return jnp.maximum(y, 0.0)

    # ---- conv1: (1+eps)*x + sum_{j in N(i)} x_j  (self term folded into adj) ----
    h = jnp.dot(adj, x_ref[...], preferred_element_type=jnp.float32)   # [Np, D] f32
    h = lin_relu(h, 0)
    h = lin_relu(h, 1)
    # F.relu(x) after conv1 is a no-op (mlp1 already ends with ReLU).

    # ---- conv2 ----
    h = jnp.dot(adj, h.astype(jnp.bfloat16), preferred_element_type=jnp.float32)
    h = lin_relu(h, 2)
    h = lin_relu(h, 3)

    # ---- global mean pool (f32 for exact 1/count scaling) ----
    g = jnp.dot(pool_ref[...], h, preferred_element_type=jnp.float32)  # [Gp, D]

    # ---- classifier (Dropout is identity in eval mode) ----
    g = lin_relu(g, 4)
    wc2 = w_ref[:, pl.ds(5 * d, c_pad)]      # bf16; padded columns are exactly 0
    bc2 = b_ref[:, pl.ds(5 * d, c_pad)]      # f32;  padded lanes hold -1e30
    logits = jnp.dot(g.astype(jnp.bfloat16), wc2,
                     preferred_element_type=jnp.float32) + bc2         # [Gp, Cp]

    # ---- log_softmax over classes (padded lanes already at -1e30 via bias) ----
    m = jnp.max(logits, axis=1, keepdims=True)
    z = logits - m
    lse = jnp.log(jnp.sum(jnp.exp(z), axis=1, keepdims=True))
    out_ref[...] = z - lse


# -----------------------------------------------------------------------------
# Parameter construction / packing (wrapper-time BN folding + slab concat)
# -----------------------------------------------------------------------------
def init_params(key, num_features, num_classes, hidden_dim):
    """Deterministic synthetic parameters (shapes match the PyTorch module)."""
    keys = jax.random.split(key, 12)
    ki = iter(keys)

    def linear(kw, fan_in, fan_out):
        bound = 1.0 / jnp.sqrt(fan_in)
        w = jax.random.uniform(kw, (fan_in, fan_out), jnp.float32, -bound, bound)
        b = jax.random.uniform(
            jax.random.fold_in(kw, 1), (fan_out,), jnp.float32, -bound, bound
        )
        return w, b

    def bn(kb, dim):
        gamma = 1.0 + 0.1 * jax.random.normal(kb, (dim,), jnp.float32)
        beta = 0.1 * jax.random.normal(jax.random.fold_in(kb, 1), (dim,), jnp.float32)
        rm = 0.01 * jax.random.normal(jax.random.fold_in(kb, 2), (dim,), jnp.float32)
        rv = 1.0 + 0.1 * jnp.abs(
            jax.random.normal(jax.random.fold_in(kb, 3), (dim,), jnp.float32)
        )
        return gamma, beta, rm, rv

    p = {}
    for name, fan_in, fan_out in (
        ("1a", num_features, hidden_dim),
        ("1b", hidden_dim, hidden_dim),
        ("2a", hidden_dim, hidden_dim),
        ("2b", hidden_dim, hidden_dim),
        ("c1", hidden_dim, hidden_dim),
    ):
        p[f"w{name}"], p[f"b{name}"] = linear(next(ki), fan_in, fan_out)
        (p[f"g{name}"], p[f"beta{name}"], p[f"rm{name}"], p[f"rv{name}"]) = bn(
            next(ki), fan_out
        )
    p["wc2"], p["bc2"] = linear(next(ki), hidden_dim, num_classes)
    return p


def pack_params(params, d_pad, c_pad):
    """Fold BN into the linears, zero-pad to lane-dense D, concat into slabs.

    Returns (w_slab bf16 [D, 5D+Cp], b_slab f32 [1, 5D+Cp]).  The padded class
    lanes of the final-layer bias are set to -1e30 so the log-softmax mask is
    free in the kernel (padded weight columns are exactly zero).
    """

    def fold(w, b, gamma, beta, rm, rv):
        scale = gamma / jnp.sqrt(rv + BN_EPS)
        shift = beta - rm * scale
        return w * scale[None, :], b * scale + shift

    layers = []
    for name in ("1a", "1b", "2a", "2b", "c1"):
        layers.append(
            fold(
                params[f"w{name}"], params[f"b{name}"],
                params[f"g{name}"], params[f"beta{name}"],
                params[f"rm{name}"], params[f"rv{name}"],
            )
        )
    layers.append((params["wc2"], params["bc2"]))  # final linear: no BN

    w_cols, b_cols = [], []
    for i, (w, b) in enumerate(layers):
        out_w = d_pad if i < 5 else c_pad
        wp = jnp.zeros((d_pad, out_w), jnp.float32).at[: w.shape[0], : w.shape[1]].set(w)
        if i < 5:
            bp = jnp.zeros((1, out_w), jnp.float32).at[0, : b.shape[0]].set(b)
        else:
            # Fold the padded-class-lane mask into the classifier bias.
            bp = jnp.full((1, out_w), NEG_INF, jnp.float32).at[0, : b.shape[0]].set(b)
        w_cols.append(wp)
        b_cols.append(bp)
    w_slab = jnp.concatenate(w_cols, axis=1).astype(jnp.bfloat16)  # [D, 5D + Cp]
    b_slab = jnp.concatenate(b_cols, axis=1)                       # [1, 5D + Cp] f32
    return w_slab, b_slab


# -----------------------------------------------------------------------------
# Forward wrapper
# -----------------------------------------------------------------------------
@functools.partial(jax.jit, static_argnames=("num_graphs", "num_classes"))
def gin_classifier_forward(x, edge_index, batch, w_slab, b_slab, num_graphs, num_classes):
    """x: [N, F] f32, edge_index: [2, E] i32, batch: [N] i32 -> [G, C] log-probs."""
    n, f = x.shape
    d = w_slab.shape[0]
    c_pad = w_slab.shape[1] - 5 * d
    n_pad = _round_up(max(n, 8), 128)       # lane-dense adjacency / pool
    g_pad = _round_up(max(num_graphs, 1), 8)

    # Node features, zero-padded to [Np, D], bf16 for the MXU.
    x_p = jnp.zeros((n_pad, d), jnp.float32).at[:n, :f].set(x).astype(jnp.bfloat16)

    # Dense adjacency via O(E) scatter-add (not an O(E*Np^2) one-hot matmul):
    # adj[i, j] = #edges j -> i, so adj @ h == sum over in-neighbors.
    adj = (
        jnp.zeros((n_pad, n_pad), jnp.float32)
        .at[edge_index[1], edge_index[0]]
        .add(1.0)
    )
    # Fold the GIN self term (1+eps)*x, eps = 0, into the adjacency.
    adj = adj + jnp.eye(n_pad, dtype=jnp.float32)
    # Small integer counts (+1) are exact in bf16 up to multiplicity ~256.
    adj = adj.astype(jnp.bfloat16)

    # Mean-pool matrix (f32); padded nodes get graph id -1 so they never match.
    batch_p = jnp.full((n_pad,), -1, jnp.int32).at[:n].set(batch)
    onehot = (jnp.arange(g_pad, dtype=jnp.int32)[:, None] == batch_p[None, :]).astype(
        jnp.float32
    )
    counts = jnp.maximum(onehot.sum(axis=1, keepdims=True), 1.0)
    pool = onehot / counts                                                      # [Gp, Np]

    flops = 2 * (
        2 * n_pad * n_pad * d      # two adjacency aggregations
        + 4 * n_pad * d * d        # four node-wise MLP linears
        + g_pad * n_pad * d        # pooling matmul
        + g_pad * d * d            # classifier hidden
        + g_pad * d * c_pad        # classifier output
    )
    transcendentals = g_pad * c_pad + g_pad
    bytes_accessed = (
        2 * (x_p.size + adj.size + w_slab.size)          # bf16 operands
        + 4 * (pool.size + b_slab.size + g_pad * c_pad)  # f32 operands / output
    )

    out_pad = pl.pallas_call(
        gin_kernel,
        out_shape=jax.ShapeDtypeStruct((g_pad, c_pad), jnp.float32),
        in_specs=[pl.BlockSpec(memory_space=pltpu.MemorySpace.VMEM)] * 5,
        out_specs=pl.BlockSpec(memory_space=pltpu.MemorySpace.VMEM),
        compiler_params=pltpu.CompilerParams(vmem_limit_bytes=48 * 1024 * 1024),
        cost_estimate=pl.CostEstimate(
            flops=int(flops),
            transcendentals=int(transcendentals),
            bytes_accessed=int(bytes_accessed),
        ),
    )(x_p, adj, pool, w_slab, b_slab)

    return out_pad[:num_graphs, :num_classes]


# -----------------------------------------------------------------------------
# Example / smoke test
# -----------------------------------------------------------------------------
if __name__ == "__main__":
    key = jax.random.PRNGKey(0)
    k_x, k_e, k_p = jax.random.split(key, 3)

    NUM_NODES = 32
    NUM_FEATURES = 16
    HIDDEN_DIM = 32
    NUM_CLASSES = 4
    NUM_GRAPHS = 2
    NUM_EDGES = 64

    x = jax.random.normal(k_x, (NUM_NODES, NUM_FEATURES), jnp.float32)
    # Random directed edges; keep them within each graph half for realism.
    src0 = jax.random.randint(k_e, (NUM_EDGES // 2,), 0, NUM_NODES // 2)
    dst0 = jax.random.randint(jax.random.fold_in(k_e, 1), (NUM_EDGES // 2,), 0, NUM_NODES // 2)
    src1 = jax.random.randint(jax.random.fold_in(k_e, 2), (NUM_EDGES // 2,), NUM_NODES // 2, NUM_NODES)
    dst1 = jax.random.randint(jax.random.fold_in(k_e, 3), (NUM_EDGES // 2,), NUM_NODES // 2, NUM_NODES)
    edge_index = jnp.stack(
        [jnp.concatenate([src0, src1]), jnp.concatenate([dst0, dst1])]
    ).astype(jnp.int32)
    batch = jnp.concatenate(
        [jnp.zeros((NUM_NODES // 2,), jnp.int32), jnp.ones((NUM_NODES // 2,), jnp.int32)]
    )

    params = init_params(k_p, NUM_FEATURES, NUM_CLASSES, HIDDEN_DIM)

    # Lane-dense padded dims (features/hidden share one D; classes -> 128).
    D_PAD = max(_round_up(NUM_FEATURES, 128), _round_up(HIDDEN_DIM, 128))
    C_PAD = _round_up(NUM_CLASSES, 128)
    w_slab, b_slab = pack_params(params, D_PAD, C_PAD)

    out = gin_classifier_forward(
        x, edge_index, batch, w_slab, b_slab, NUM_GRAPHS, NUM_CLASSES
    )
    out = jax.block_until_ready(out)

    assert out.shape == (NUM_GRAPHS, NUM_CLASSES)
    assert bool(jnp.all(jnp.isfinite(out)))
    # log_softmax rows must exponentiate to probability distributions.
    row_sums = jnp.sum(jnp.exp(out), axis=1)
    assert bool(jnp.allclose(row_sums, 1.0, atol=1e-3)), row_sums

    print("KERNEL_OK")
</pallas_src>

<mosaic_0001>
module attributes {stable_mosaic.version = 11 : i64} {
  func.func private @main(%arg0: i32) attributes {dimension_semantics = [#tpu.dimension_semantics<core_parallel>], iteration_bounds = array<i64: 2>, tpu.core_type = #tpu.core_type<sc_scalar_subcore>, window_params = []} {
    return
  }
}

module attributes {stable_mosaic.version = 11 : i64} {
  func.func private @main(%arg0: i32) attributes {dimension_semantics = [#tpu.dimension_semantics<core_parallel>], iteration_bounds = array<i64: 2>, tpu.core_type = #tpu.core_type<sc_scalar_subcore>, window_params = []} {
    return
  }
}

module attributes {stable_mosaic.version = 11 : i64} {
  func.func @gin_kernel(%arg0: memref<128x128xbf16, #tpu.memory_space<vmem>>, %arg1: memref<128x128xbf16, #tpu.memory_space<vmem>>, %arg2: memref<8x128xf32, #tpu.memory_space<vmem>>, %arg3: memref<128x768xbf16, #tpu.memory_space<vmem>>, %arg4: memref<1x768xf32, #tpu.memory_space<vmem>>, %arg5: memref<8x128xf32, #tpu.memory_space<vmem>>) attributes {dimension_semantics = [], scalar_prefetch = 0 : i64, scratch_operands = 0 : i64, tpu.core_type = #tpu.core_type<tc>} {
    %c0 = arith.constant 0 : index
    %c0_0 = arith.constant 0 : index
    %0 = vector.load %arg1[%c0, %c0_0] : memref<128x128xbf16, #tpu.memory_space<vmem>>, vector<128x128xbf16>
    %c0_1 = arith.constant 0 : index
    %c0_2 = arith.constant 0 : index
    %1 = vector.load %arg0[%c0_1, %c0_2] : memref<128x128xbf16, #tpu.memory_space<vmem>>, vector<128x128xbf16>
    %cst = arith.constant dense<0.000000e+00> : vector<128x128xf32>
    %2 = tpu.matmul %0, %1, %cst {dimension_numbers = #tpu.dot_dimension_numbers<[1], [0], [0], [1], [0, 0, 1, 1], [], []>} : vector<128x128xbf16>, vector<128x128xbf16>, vector<128x128xf32> -> vector<128x128xf32>
    %c0_3 = arith.constant 0 : index
    %c0_4 = arith.constant 0 : index
    %3 = vector.load %arg3[%c0_3, %c0_4] : memref<128x768xbf16, #tpu.memory_space<vmem>>, vector<128x128xbf16>
    %c0_5 = arith.constant 0 : index
    %c0_6 = arith.constant 0 : index
    %4 = vector.load %arg4[%c0_5, %c0_6] : memref<1x768xf32, #tpu.memory_space<vmem>>, vector<1x128xf32>
    %5 = arith.truncf %2 : vector<128x128xf32> to vector<128x128xbf16>
    %cst_7 = arith.constant dense<0.000000e+00> : vector<128x128xf32>
    %6 = tpu.matmul %5, %3, %cst_7 {dimension_numbers = #tpu.dot_dimension_numbers<[1], [0], [0], [1], [0, 0, 1, 1], [], []>} : vector<128x128xbf16>, vector<128x128xbf16>, vector<128x128xf32> -> vector<128x128xf32>
    %7 = vector.broadcast %4 : vector<1x128xf32> to vector<128x128xf32>
    %8 = arith.addf %6, %7 : vector<128x128xf32>
    %cst_8 = arith.constant 0.000000e+00 : f32
    %9 = vector.broadcast %cst_8 : f32 to vector<128x128xf32>
    %10 = arith.maximumf %8, %9 : vector<128x128xf32>
    %c0_9 = arith.constant 0 : index
    %c128 = arith.constant 128 : index
    %11 = vector.load %arg3[%c0_9, %c128] : memref<128x768xbf16, #tpu.memory_space<vmem>>, vector<128x128xbf16>
    %c0_10 = arith.constant 0 : index
    %c128_11 = arith.constant 128 : index
    %12 = vector.load %arg4[%c0_10, %c128_11] : memref<1x768xf32, #tpu.memory_space<vmem>>, vector<1x128xf32>
    %13 = arith.truncf %10 : vector<128x128xf32> to vector<128x128xbf16>
    %cst_12 = arith.constant dense<0.000000e+00> : vector<128x128xf32>
    %14 = tpu.matmul %13, %11, %cst_12 {dimension_numbers = #tpu.dot_dimension_numbers<[1], [0], [0], [1], [0, 0, 1, 1], [], []>} : vector<128x128xbf16>, vector<128x128xbf16>, vector<128x128xf32> -> vector<128x128xf32>
    %15 = vector.broadcast %12 : vector<1x128xf32> to vector<128x128xf32>
    %16 = arith.addf %14, %15 : vector<128x128xf32>
    %cst_13 = arith.constant 0.000000e+00 : f32
    %17 = vector.broadcast %cst_13 : f32 to vector<128x128xf32>
    %18 = arith.maximumf %16, %17 : vector<128x128xf32>
    %19 = arith.truncf %18 : vector<128x128xf32> to vector<128x128xbf16>
    %cst_14 = arith.constant dense<0.000000e+00> : vector<128x128xf32>
    %20 = tpu.matmul %0, %19, %cst_14 {dimension_numbers = #tpu.dot_dimension_numbers<[1], [0], [0], [1], [0, 0, 1, 1], [], []>} : vector<128x128xbf16>, vector<128x128xbf16>, vector<128x128xf32> -> vector<128x128xf32>
    %c0_15 = arith.constant 0 : index
    %c256 = arith.constant 256 : index
    %21 = vector.load %arg3[%c0_15, %c256] : memref<128x768xbf16, #tpu.memory_space<vmem>>, vector<128x128xbf16>
    %c0_16 = arith.constant 0 : index
    %c256_17 = arith.constant 256 : index
    %22 = vector.load %arg4[%c0_16, %c256_17] : memref<1x768xf32, #tpu.memory_space<vmem>>, vector<1x128xf32>
    %23 = arith.truncf %20 : vector<128x128xf32> to vector<128x128xbf16>
    %cst_18 = arith.constant dense<0.000000e+00> : vector<128x128xf32>
    %24 = tpu.matmul %23, %21, %cst_18 {dimension_numbers = #tpu.dot_dimension_numbers<[1], [0], [0], [1], [0, 0, 1, 1], [], []>} : vector<128x128xbf16>, vector<128x128xbf16>, vector<128x128xf32> -> vector<128x128xf32>
    %25 = vector.broadcast %22 : vector<1x128xf32> to vector<128x128xf32>
    %26 = arith.addf %24, %25 : vector<128x128xf32>
    %cst_19 = arith.constant 0.000000e+00 : f32
    %27 = vector.broadcast %cst_19 : f32 to vector<128x128xf32>
    %28 = arith.maximumf %26, %27 : vector<128x128xf32>
    %c0_20 = arith.constant 0 : index
    %c384 = arith.constant 384 : index
    %29 = vector.load %arg3[%c0_20, %c384] : memref<128x768xbf16, #tpu.memory_space<vmem>>, vector<128x128xbf16>
    %c0_21 = arith.constant 0 : index
    %c384_22 = arith.constant 384 : index
    %30 = vector.load %arg4[%c0_21, %c384_22] : memref<1x768xf32, #tpu.memory_space<vmem>>, vector<1x128xf32>
    %31 = arith.truncf %28 : vector<128x128xf32> to vector<128x128xbf16>
    %cst_23 = arith.constant dense<0.000000e+00> : vector<128x128xf32>
    %32 = tpu.matmul %31, %29, %cst_23 {dimension_numbers = #tpu.dot_dimension_numbers<[1], [0], [0], [1], [0, 0, 1, 1], [], []>} : vector<128x128xbf16>, vector<128x128xbf16>, vector<128x128xf32> -> vector<128x128xf32>
    %33 = vector.broadcast %30 : vector<1x128xf32> to vector<128x128xf32>
    %34 = arith.addf %32, %33 : vector<128x128xf32>
    %cst_24 = arith.constant 0.000000e+00 : f32
    %35 = vector.broadcast %cst_24 : f32 to vector<128x128xf32>
    %36 = arith.maximumf %34, %35 : vector<128x128xf32>
    %c0_25 = arith.constant 0 : index
    %c0_26 = arith.constant 0 : index
    %37 = vector.load %arg2[%c0_25, %c0_26] : memref<8x128xf32, #tpu.memory_space<vmem>>, vector<8x128xf32>
    %cst_27 = arith.constant dense<0.000000e+00> : vector<8x128xf32>
    %38 = tpu.matmul %37, %36, %cst_27 {dimension_numbers = #tpu.dot_dimension_numbers<[1], [0], [0], [1], [0, 0, 1, 1], [], []>} : vector<8x128xf32>, vector<128x128xf32>, vector<8x128xf32> -> vector<8x128xf32>
    %c0_28 = arith.constant 0 : index
    %c512 = arith.constant 512 : index
    %39 = vector.load %arg3[%c0_28, %c512] : memref<128x768xbf16, #tpu.memory_space<vmem>>, vector<128x128xbf16>
    %c0_29 = arith.constant 0 : index
    %c512_30 = arith.constant 512 : index
    %40 = vector.load %arg4[%c0_29, %c512_30] : memref<1x768xf32, #tpu.memory_space<vmem>>, vector<1x128xf32>
    %41 = arith.truncf %38 : vector<8x128xf32> to vector<8x128xbf16>
    %cst_31 = arith.constant dense<0.000000e+00> : vector<8x128xf32>
    %42 = tpu.matmul %41, %39, %cst_31 {dimension_numbers = #tpu.dot_dimension_numbers<[1], [0], [0], [1], [0, 0, 1, 1], [], []>} : vector<8x128xbf16>, vector<128x128xbf16>, vector<8x128xf32> -> vector<8x128xf32>
    %43 = vector.broadcast %40 : vector<1x128xf32> to vector<8x128xf32>
    %44 = arith.addf %42, %43 : vector<8x128xf32>
    %cst_32 = arith.constant 0.000000e+00 : f32
    %45 = vector.broadcast %cst_32 : f32 to vector<8x128xf32>
    %46 = arith.maximumf %44, %45 : vector<8x128xf32>
    %c0_33 = arith.constant 0 : index
    %c640 = arith.constant 640 : index
    %47 = vector.load %arg3[%c0_33, %c640] : memref<128x768xbf16, #tpu.memory_space<vmem>>, vector<128x128xbf16>
    %c0_34 = arith.constant 0 : index
    %c640_35 = arith.constant 640 : index
    %48 = vector.load %arg4[%c0_34, %c640_35] : memref<1x768xf32, #tpu.memory_space<vmem>>, vector<1x128xf32>
    %49 = arith.truncf %46 : vector<8x128xf32> to vector<8x128xbf16>
    %cst_36 = arith.constant dense<0.000000e+00> : vector<8x128xf32>
    %50 = tpu.matmul %49, %47, %cst_36 {dimension_numbers = #tpu.dot_dimension_numbers<[1], [0], [0], [1], [0, 0, 1, 1], [], []>} : vector<8x128xbf16>, vector<128x128xbf16>, vector<8x128xf32> -> vector<8x128xf32>
    %51 = vector.broadcast %48 : vector<1x128xf32> to vector<8x128xf32>
    %52 = arith.addf %50, %51 : vector<8x128xf32>
    %cst_37 = arith.constant dense<0xFF800000> : vector<8xf32>
    %53 = vector.multi_reduction <maximumf>, %52, %cst_37 [1] : vector<8x128xf32> to vector<8xf32>
    %54 = vector.shape_cast %53 : vector<8xf32> to vector<8x1xf32>
    %55 = vector.broadcast %54 : vector<8x1xf32> to vector<8x128xf32>
    %56 = arith.subf %52, %55 : vector<8x128xf32>
    %57 = math.exp %56 : vector<8x128xf32>
    %cst_38 = arith.constant dense<0.000000e+00> : vector<8xf32>
    %58 = vector.multi_reduction <add>, %57, %cst_38 [1] : vector<8x128xf32> to vector<8xf32>
    %59 = vector.shape_cast %58 : vector<8xf32> to vector<8x1xf32>
    %60 = math.log %59 : vector<8x1xf32>
    %61 = vector.broadcast %60 : vector<8x1xf32> to vector<8x128xf32>
    %62 = arith.subf %56, %61 : vector<8x128xf32>
    %c0_39 = arith.constant 0 : index
    %c0_40 = arith.constant 0 : index
    %63 = vector.load %arg5[%c0_39, %c0_40] : memref<8x128xf32, #tpu.memory_space<vmem>>, vector<8x128xf32>
    tpu.vector_store %arg5[%c0_39, %c0_40], %62 {strides = array<i32>} : memref<8x128xf32, #tpu.memory_space<vmem>>, vector<8x128xf32>,
    return
  }
}

</mosaic_0001>

<bundles_post_ra>
// kernel: gin_classifier_forward.1
= control target key start
LH: loop header
LB: loop body
LE: loop exit
PB: predicated region body
PF: predicated region fallthrough
CT: control target
= control target key end

     0   :  { %vm1969_vm0 = vmmov 0   ;;  %s2292_s0 = inlined_call_operand.vmem [shape: bf16[128,128], index: 0, kind: input, shape index: {}]   ;;  %s2293_s1 = inlined_call_operand.vmem [shape: bf16[128,128], index: 1, kind: input, shape index: {}]   ;;  %s2294_s3 = inlined_call_operand.vmem [shape: bf16[128,768], index: 3, kind: input, shape index: {}]   ;;  %s2295_s4 = inlined_call_operand.vmem [shape: f32[1,768], index: 4, kind: input, shape index: {}]   ;;  %s2296_s2 = inlined_call_operand.vmem [shape: f32[8,128], index: 2, kind: input, shape index: {}]   ;;  %s2297_s5 = inlined_call_operand.vmem [shape: f32[8,128], index: 5, kind: output, shape index: {}]  }
   0x1   :  { %v1900_v0 = vld [vmem:[%s2292_s0 + $0x38] sm:$0xff]   ;;  %v1901_v1 = vld [vmem:[%s2292_s0 + $0x30] sm:$0xff]   ;;  %v1902_v2 = vld [vmem:[%s2292_s0 + $0x28] sm:$0xff]  }
   0x2   :  { %1631 = vmatprep.subr.bf16.mxu0 %v1900_v0  ;;  %v1903_v3 = vld [vmem:[%s2292_s0 + $0x20] sm:$0xff]   ;;  %v1904_v5 = vld [vmem:[%s2292_s0 + $0x18] sm:$0xff]   ;;  %v1905_v6 = vld [vmem:[%s2292_s0 + $0x10] sm:$0xff]  }
   0x3   :  { %1632 = vmatpush3.bf16.msra.mxu0 %v1900_v0  ;;  %v2015_v4 = vld [vmem:[%s2293_s1] sm:$0xff]   ;;  %v1916_v7 = vld [vmem:[%s2294_s3 + $0x150] ss:$24 sps:$4 sm:$0xff]   ;;  %v2063_v17 = vld [vmem:[%s2293_s1 + $0x18] sm:$0xff]  }
   0x4   :  { %1633 = vmatprep.subr.bf16.mxu0 %v1901_v1  ;;  %1647 = vmatprep.mubr.bf16.mxu0 %v2015_v4  ;;  %v1917_v8 = vld [vmem:[%s2294_s3 + $0x120] ss:$24 sps:$4 sm:$0xff]   ;;  %v1906_v9 = vld [vmem:[%s2292_s0 + $0x8] sm:$0xff]   ;;  %v2053_v15 = vld [vmem:[%s2293_s1 + $0x10] sm:$0xff]  }
   0x5   :  { %1663 = vmatprep.subr.bf16.mxu1 %v1916_v7  ;;  %v1918_v10 = vld [vmem:[%s2294_s3 + $0xf0] ss:$24 sps:$4 sm:$0xff]   ;;  %v1907_v11 = vld [vmem:[%s2292_s0] sm:$0xff]   ;;  %v2087_v21 = vld [vmem:[%s2293_s1 + $0x38] sm:$0xff]  }
   0x6   :  { %1664 = vmatpush3.bf16.msra.mxu1 %v1916_v7  ;;  %v1919_v12 = vld [vmem:[%s2294_s3 + $0xc0] ss:$24 sps:$4 sm:$0xff]   ;;  %v1920_v13 = vld [vmem:[%s2294_s3 + $0x90] ss:$24 sps:$4 sm:$0xff]   ;;  %v1924_v24 = vld [vmem:[%s2294_s3 + $0x154] ss:$24 sps:$4 sm:$0xff]  }
   0x7   :  { %1634 = vmatpush3.bf16.msra.mxu0 %v1901_v1  ;;  %1665 = vmatprep.subr.bf16.mxu1 %v1917_v8  ;;  %v2048_v14 = vld [vmem:[%s2293_s1 + $0x8] sm:$0xff]   ;;  %v1921_v16 = vld [vmem:[%s2294_s3 + $0x60] ss:$24 sps:$4 sm:$0xff]   ;;  %v2080_v20 = vld [vmem:[%s2293_s1 + $0x30] sm:$0xff]  }
   0x8   :  { %1635 = vmatprep.subr.bf16.mxu0 %v1902_v2  ;;  %v2068_v18 = vld [vmem:[%s2293_s1 + $0x20] sm:$0xff]   ;;  %v2075_v19 = vld [vmem:[%s2293_s1 + $0x28] sm:$0xff]  }
   0x9   :  { %v1922_v22 = vld [vmem:[%s2294_s3 + $0x30] ss:$24 sps:$4 sm:$0xff]   ;;  %v1923_v23 = vld [vmem:[%s2294_s3] ss:$24 sps:$4 sm:$0xff]   ;;  %v1925_v25 = vld [vmem:[%s2294_s3 + $0x124] ss:$24 sps:$4 sm:$0xff]  }
   0xa   :  { %1666 = vmatpush3.bf16.msra.mxu1 %v1917_v8  ;;  %v1926_v26 = vld [vmem:[%s2294_s3 + $0xf4] ss:$24 sps:$4 sm:$0xff]   ;;  %v1927_v27 = vld [vmem:[%s2294_s3 + $0xc4] ss:$24 sps:$4 sm:$0xff]   ;;  %v1446_v58 = vld [vmem:[%s2295_s4] ss:$0 sm:$0xff] }
   0xb   :  { %1636 = vmatpush3.bf16.msra.mxu0 %v1902_v2  ;;  %1667 = vmatprep.subr.bf16.mxu1 %v1918_v10  ;;  %v1928_v28 = vld [vmem:[%s2294_s3 + $0x94] ss:$24 sps:$4 sm:$0xff]   ;;  %v1929_v53 = vld [vmem:[%s2294_s3 + $0x64] ss:$24 sps:$4 sm:$0xff]  }
   0xc   :  { %1637 = vmatprep.subr.bf16.mxu0 %v1903_v3  ;;  %v1930_v54 = vld [vmem:[%s2294_s3 + $0x34] ss:$24 sps:$4 sm:$0xff]   ;;  %v1931_v55 = vld [vmem:[%s2294_s3 + $0x4] ss:$24 sps:$4 sm:$0xff]  }
   0xe   :  { %1668 = vmatpush3.bf16.msra.mxu1 %v1918_v10 }
   0xf   :  { %1638 = vmatpush3.bf16.msra.mxu0 %v1903_v3  ;;  %1669 = vmatprep.subr.bf16.mxu1 %v1919_v12 }
  0x10   :  { %1639 = vmatprep.subr.bf16.mxu0 %v1904_v5 }
  0x12   :  { %1670 = vmatpush3.bf16.msra.mxu1 %v1919_v12 }
  0x13   :  { %1640 = vmatpush3.bf16.msra.mxu0 %v1904_v5  ;;  %1671 = vmatprep.subr.bf16.mxu1 %v1920_v13 }
  0x14   :  { %1641 = vmatprep.subr.bf16.mxu0 %v1905_v6 }
  0x16   :  { %1672 = vmatpush3.bf16.msra.mxu1 %v1920_v13 }
  0x17   :  { %1642 = vmatpush3.bf16.msra.mxu0 %v1905_v6  ;;  %1673 = vmatprep.subr.bf16.mxu1 %v1921_v16 }
  0x18   :  { %1643 = vmatprep.subr.bf16.mxu0 %v1906_v9 }
  0x1a   :  { %1674 = vmatpush3.bf16.msra.mxu1 %v1921_v16 }
  0x1b   :  { %1644 = vmatpush3.bf16.msra.mxu0 %v1906_v9  ;;  %1675 = vmatprep.subr.bf16.mxu1 %v1922_v22 }
  0x1c   :  { %1645 = vmatprep.subr.bf16.mxu0 %v1907_v11 }
  0x1e   :  { %1676 = vmatpush3.bf16.msra.mxu1 %v1922_v22 }
  0x1f   :  { %1646 = vmatpush3.bf16.msra.mxu0 %v1907_v11  ;;  %1677 = vmatprep.subr.bf16.mxu1 %v1923_v23 }
  0x20   :  { %1695 = vmatprep.subr.bf16.mxu0 %v1924_v24 }
  0x22   :  { %1648 = vmatmul.mubr.bf16.vlgmr.msra.gmra.mxu0 %v2048_v14  ;;  %1678 = vmatpush3.bf16.msra.mxu1 %v1923_v23 }
  0x23   :  { %1651 = vmatprep.mubr.bf16.mxu0 %v2053_v15  ;;  %1696 = vmatpush3.bf16.msra.mxu0 %v1924_v24 }
  0x24   :  { %1697 = vmatprep.subr.bf16.mxu0 %v1925_v25 }
  0x27   :  { %1698 = vmatpush3.bf16.msra.mxu0 %v1925_v25 }
  0x28   :  { %1699 = vmatprep.subr.bf16.mxu0 %v1926_v26 }
  0x2a   :  { %1652 = vmatmul.mubr.bf16.gmra.mxu0 %v2063_v17 }
  0x2b   :  { %1655 = vmatprep.mubr.bf16.mxu0 %v2068_v18  ;;  %1700 = vmatpush3.bf16.msra.mxu0 %v1926_v26 }
  0x2c   :  { %1701 = vmatprep.subr.bf16.mxu0 %v1927_v27 }
  0x2f   :  { %1702 = vmatpush3.bf16.msra.mxu0 %v1927_v27 }
  0x30   :  { %1703 = vmatprep.subr.bf16.mxu0 %v1928_v28 }
  0x32   :  { %1656 = vmatmul.mubr.bf16.gmra.mxu0 %v2075_v19 }
  0x33   :  { %1659 = vmatprep.mubr.bf16.mxu0 %v2080_v20  ;;  %1704 = vmatpush3.bf16.msra.mxu0 %v1928_v28 }
  0x34   :  { %1705 = vmatprep.subr.bf16.mxu0 %v1929_v53 }
  0x37   :  { %1706 = vmatpush3.bf16.msra.mxu0 %v1929_v53 }
  0x38   :  { %1707 = vmatprep.subr.bf16.mxu0 %v1930_v54 }
  0x3a   :  { %1660 = vmatmul.mubr.bf16.gmra.mxu0 %v2087_v21 }
  0x3b   :  { %1708 = vmatpush3.bf16.msra.mxu0 %v1930_v54 }
  0x3c   :  { %1709 = vmatprep.subr.bf16.mxu0 %v1931_v55 }
  0x3f   :  { %1710 = vmatpush3.bf16.msra.mxu0 %v1931_v55 }
  0xe2   :  { %v1649_v29 = vpop.f32.mrf.mxu0 }
  0xe4   :  { %v183_v30 = vpop.f32.mrf.mxu0 }
  0xe6   :  { %v1650_v31 = vpop.f32.mrf.mxu0 }
  0xe7   :  { %v264_v34 = vpack.c.bf16 %v1650_v31, %v1649_v29 }
  0xe8   :  { %v186_v32 = vpop.f32.mrf.mxu0 }
  0xe9   :  { %v263_v33 = vpack.c.bf16 %v186_v32, %v183_v30 }
  0xea   :  { %v1653_v35 = vpop.f32.mrf.mxu0 }
  0xeb   :  { %1679 = vmatprep.mubr.bf16.mxu1 %v263_v33 }
  0xec   :  { %v199_v36 = vpop.f32.mrf.mxu0  ;;  %1680 = vmatmul.mubr.bf16.vlgmr.msra.gmra.mxu1 %v264_v34 }
  0xee   :  { %v1654_v37 = vpop.f32.mrf.mxu0 }
  0xef   :  { %v266_v40 = vpack.c.bf16 %v1654_v37, %v1653_v35 }
  0xf0   :  { %v202_v38 = vpop.f32.mrf.mxu0 }
  0xf1   :  { %v265_v39 = vpack.c.bf16 %v202_v38, %v199_v36 }
  0xf2   :  { %v1657_v41 = vpop.f32.mrf.mxu0 }
  0xf3   :  { %1683 = vmatprep.mubr.bf16.mxu1 %v265_v39 }
  0xf4   :  { %v215_v42 = vpop.f32.mrf.mxu0  ;;  %1684 = vmatmul.mubr.bf16.gmra.mxu1 %v266_v40 }
  0xf6   :  { %v1658_v43 = vpop.f32.mrf.mxu0 }
  0xf7   :  { %v268_v46 = vpack.c.bf16 %v1658_v43, %v1657_v41 }
  0xf8   :  { %v218_v44 = vpop.f32.mrf.mxu0 }
  0xf9   :  { %v267_v45 = vpack.c.bf16 %v218_v44, %v215_v42 }
  0xfa   :  { %v1661_v47 = vpop.f32.mrf.mxu0 }
  0xfb   :  { %1687 = vmatprep.mubr.bf16.mxu1 %v267_v45 }
  0xfc   :  { %v231_v48 = vpop.f32.mrf.mxu0  ;;  %1688 = vmatmul.mubr.bf16.gmra.mxu1 %v268_v46 }
  0xfe   :  { %v1662_v49 = vpop.f32.mrf.mxu0 }
  0xff   :  { %v270_v52 = vpack.c.bf16 %v1662_v49, %v1661_v47 }
 0x100   :  { %v234_v50 = vpop.f32.mrf.mxu0 }
 0x101   :  { %v269_v51 = vpack.c.bf16 %v234_v50, %v231_v48 }
 0x103   :  { %1691 = vmatprep.mubr.bf16.mxu1 %v269_v51 }
 0x104   :  { %1692 = vmatmul.mubr.bf16.gmra.mxu1 %v270_v52 }
 0x105   :  { %1743 = vmatprep.mubr.bf16.mxu1 %v2015_v4 }
 0x1ac   :  { %v1681_v56 = vpop.f32.mrf.mxu1 }
 0x1ad   :  { %v368_v62 = vadd.f32 %v1681_v56, %v1446_v58  ;;  %v1932_v56 = vld [vmem:[%s2294_s3 + $0x158] ss:$24 sps:$4 sm:$0xff]  }
 0x1ae   :  { %v359_v57 = vpop.f32.mrf.mxu1  ;;  %1759 = vmatprep.subr.bf16.mxu0 %v1932_v56 }
 0x1af   :  { %v360_v60 = vadd.f32 %v1446_v58, %v359_v57  ;;  %v424_v5 = vmax.f32 %v368_v62, 0.0  ;;  %v1933_v57 = vld [vmem:[%s2294_s3 + $0x128] ss:$24 sps:$4 sm:$0xff]  }
 0x1b0   :  { %v1682_v59 = vpop.f32.mrf.mxu1 }
 0x1b1   :  { %v371_v61 = vadd.f32 %v1682_v59, %v1446_v58  ;;  %v422_v3 = vmax.f32 %v360_v60, 0.0  ;;  %v1935_v59 = vld [vmem:[%s2294_s3 + $0xc8] ss:$24 sps:$4 sm:$0xff]   ;;  %v1936_v60 = vld [vmem:[%s2294_s3 + $0x98] ss:$24 sps:$4 sm:$0xff]  }
 0x1b2   :  { %v362_v63 = vpop.f32.mrf.mxu1 }
 0x1b3   :  { %v363_v0 = vadd.f32 %v1446_v58, %v362_v63  ;;  %v425_v1 = vmax.f32 %v371_v61, 0.0  ;;  %v1937_v61 = vld [vmem:[%s2294_s3 + $0x68] ss:$24 sps:$4 sm:$0xff]  }
 0x1b4   :  { %v1685_v2 = vpop.f32.mrf.mxu1 }
 0x1b5   :  { %v423_v4 = vmax.f32 %v363_v0, 0.0  ;;  %v456_v8 = vpack.c.bf16 %v425_v1, %v424_v5  ;;  %v384_v12 = vadd.f32 %v1685_v2, %v1446_v58 }
 0x1b6   :  { %v375_v6 = vpop.f32.mrf.mxu1 }
 0x1b7   :  { %v455_v7 = vpack.c.bf16 %v423_v4, %v422_v3  ;;  %v376_v10 = vadd.f32 %v1446_v58, %v375_v6  ;;  %v428_v26 = vmax.f32 %v384_v12, 0.0 }
 0x1b8   :  { %v1686_v9 = vpop.f32.mrf.mxu1 }
 0x1b9   :  { %v387_v11 = vadd.f32 %v1686_v9, %v1446_v58  ;;  %1711 = vmatprep.mubr.bf16.mxu0 %v455_v7  ;;  %v426_v24 = vmax.f32 %v376_v10, 0.0 }
 0x1ba   :  { %v378_v13 = vpop.f32.mrf.mxu1  ;;  %1712 = vmatmul.mubr.bf16.vlgmr.msra.gmra.mxu0 %v456_v8 }
 0x1bb   :  { %v379_v16 = vadd.f32 %v1446_v58, %v378_v13  ;;  %v429_v22 = vmax.f32 %v387_v11, 0.0  ;;  %1760 = vmatpush3.bf16.msra.mxu0 %v1932_v56  ;;  %v1455_v11 = vld [vmem:[%s2295_s4 + $0x1] ss:$0 sm:$0xff] }
 0x1bc   :  { %v1689_v23 = vpop.f32.mrf.mxu1  ;;  %1761 = vmatprep.subr.bf16.mxu0 %v1933_v57 }
 0x1bd   :  { %v427_v25 = vmax.f32 %v379_v16, 0.0  ;;  %v458_v29 = vpack.c.bf16 %v429_v22, %v428_v26  ;;  %v400_v33 = vadd.f32 %v1689_v23, %v1446_v58 }
 0x1be   :  { %v391_v27 = vpop.f32.mrf.mxu1 }
 0x1bf   :  { %v457_v28 = vpack.c.bf16 %v427_v25, %v426_v24  ;;  %v392_v31 = vadd.f32 %v1446_v58, %v391_v27  ;;  %v432_v40 = vmax.f32 %v400_v33, 0.0  ;;  %1762 = vmatpush3.bf16.msra.mxu0 %v1933_v57 }
 0x1c0   :  { %v1690_v30 = vpop.f32.mrf.mxu1 }
 0x1c1   :  { %v403_v32 = vadd.f32 %v1690_v30, %v1446_v58  ;;  %1715 = vmatprep.mubr.bf16.mxu0 %v457_v28  ;;  %v430_v38 = vmax.f32 %v392_v31, 0.0 }
 0x1c2   :  { %v394_v34 = vpop.f32.mrf.mxu1  ;;  %1716 = vmatmul.mubr.bf16.gmra.mxu0 %v458_v29 }
 0x1c3   :  { %v395_v35 = vadd.f32 %v1446_v58, %v394_v34  ;;  %v433_v36 = vmax.f32 %v403_v32, 0.0 }
 0x1c4   :  { %v1693_v37 = vpop.f32.mrf.mxu1 }
 0x1c5   :  { %v431_v39 = vmax.f32 %v395_v35, 0.0  ;;  %v460_v43 = vpack.c.bf16 %v433_v36, %v432_v40  ;;  %v416_v47 = vadd.f32 %v1693_v37, %v1446_v58 }
 0x1c6   :  { %v407_v41 = vpop.f32.mrf.mxu1 }
 0x1c7   :  { %v459_v42 = vpack.c.bf16 %v431_v39, %v430_v38  ;;  %v408_v45 = vadd.f32 %v1446_v58, %v407_v41  ;;  %v436_v53 = vmax.f32 %v416_v47, 0.0 }
 0x1c8   :  { %v1694_v44 = vpop.f32.mrf.mxu1 }
 0x1c9   :  { %v419_v46 = vadd.f32 %v1694_v44, %v1446_v58  ;;  %1719 = vmatprep.mubr.bf16.mxu0 %v459_v42  ;;  %v434_v51 = vmax.f32 %v408_v45, 0.0 }
 0x1ca   :  { %v410_v48 = vpop.f32.mrf.mxu1  ;;  %1720 = vmatmul.mubr.bf16.gmra.mxu0 %v460_v43 }
 0x1cb   :  { %v411_v49 = vadd.f32 %v1446_v58, %v410_v48  ;;  %v437_v50 = vmax.f32 %v419_v46, 0.0  ;;  %v1934_v58 = vld [vmem:[%s2294_s3 + $0xf8] ss:$24 sps:$4 sm:$0xff]  }
 0x1cc   :  { %1763 = vmatprep.subr.bf16.mxu0 %v1934_v58 }
 0x1cd   :  { %v435_v52 = vmax.f32 %v411_v49, 0.0  ;;  %v462_v55 = vpack.c.bf16 %v437_v50, %v436_v53  ;;  %1764 = vmatpush3.bf16.msra.mxu0 %v1934_v58 }
 0x1ce   :  { %1765 = vmatprep.subr.bf16.mxu0 %v1935_v59 }
 0x1cf   :  { %v461_v54 = vpack.c.bf16 %v435_v52, %v434_v51 }
 0x1d1   :  { %1723 = vmatprep.mubr.bf16.mxu0 %v461_v54  ;;  %1766 = vmatpush3.bf16.msra.mxu0 %v1935_v59 }
 0x1d2   :  { %1724 = vmatmul.mubr.bf16.gmra.mxu0 %v462_v55  ;;  %1767 = vmatprep.subr.bf16.mxu0 %v1936_v60 }
 0x1d5   :  { %1768 = vmatpush3.bf16.msra.mxu0 %v1936_v60 }
 0x1d6   :  { %1769 = vmatprep.subr.bf16.mxu0 %v1937_v61 }
 0x1d9   :  { %1770 = vmatpush3.bf16.msra.mxu0 %v1937_v61 }
 0x27a   :  { %v1713_v62 = vpop.f32.mrf.mxu0 }
 0x27b   :  { %v560_v51 = vadd.f32 %v1713_v62, %v1455_v11  ;;  %v1938_v62 = vld [vmem:[%s2294_s3 + $0x38] ss:$24 sps:$4 sm:$0xff]  }
 0x27c   :  { %v551_v63 = vpop.f32.mrf.mxu0  ;;  %1771 = vmatprep.subr.bf16.mxu0 %v1938_v62 }
 0x27d   :  { %v616_v56 = vmax.f32 %v560_v51, 0.0  ;;  %v552_v57 = vadd.f32 %v1455_v11, %v551_v63  ;;  %1772 = vmatpush3.bf16.msra.mxu0 %v1938_v62 }
 0x27e   :  { %v1714_v0 = vpop.f32.mrf.mxu0 }
 0x27f   :  { %v563_v48 = vadd.f32 %v1714_v0, %v1455_v11  ;;  %v614_v60 = vmax.f32 %v552_v57, 0.0 }
 0x280   :  { %v554_v1 = vpop.f32.mrf.mxu0 }
 0x281   :  { %v617_v53 = vmax.f32 %v563_v48, 0.0  ;;  %v555_v54 = vadd.f32 %v1455_v11, %v554_v1 }
 0x282   :  { %v1717_v2 = vpop.f32.mrf.mxu0 }
 0x283   :  { %v576_v41 = vadd.f32 %v1717_v2, %v1455_v11  ;;  %v631_v58 = vpack.c.bf16 %v617_v53, %v616_v56  ;;  %v615_v59 = vmax.f32 %v555_v54, 0.0 }
 0x284   :  { %v567_v3 = vpop.f32.mrf.mxu0 }
 0x285   :  { %v620_v46 = vmax.f32 %v576_v41, 0.0  ;;  %v568_v47 = vadd.f32 %v1455_v11, %v567_v3  ;;  %v630_v61 = vpack.c.bf16 %v615_v59, %v614_v60 }
 0x286   :  { %v1718_v4 = vpop.f32.mrf.mxu0 }
 0x287   :  { %v579_v38 = vadd.f32 %v1718_v4, %v1455_v11  ;;  %v618_v52 = vmax.f32 %v568_v47, 0.0 }
 0x288   :  { %v570_v5 = vpop.f32.mrf.mxu0 }
 0x289   :  { %v621_v43 = vmax.f32 %v579_v38, 0.0  ;;  %v571_v44 = vadd.f32 %v1455_v11, %v570_v5 }
 0x28a   :  { %v1721_v6 = vpop.f32.mrf.mxu0 }
 0x28b   :  { %v592_v29 = vadd.f32 %v1721_v6, %v1455_v11  ;;  %v633_v49 = vpack.c.bf16 %v621_v43, %v620_v46  ;;  %v619_v50 = vmax.f32 %v571_v44, 0.0 }
 0x28c   :  { %v583_v7 = vpop.f32.mrf.mxu0 }
 0x28d   :  { %v624_v36 = vmax.f32 %v592_v29, 0.0  ;;  %v584_v37 = vadd.f32 %v1455_v11, %v583_v7  ;;  %v632_v55 = vpack.c.bf16 %v619_v50, %v618_v52  ;;  %v1945_v29 = vld [vmem:[%s2294_s3 + $0x6c] ss:$24 sps:$4 sm:$0xff]  }
 0x28e   :  { %v1722_v8 = vpop.f32.mrf.mxu0 }
 0x28f   :  { %v595_v25 = vadd.f32 %v1722_v8, %v1455_v11  ;;  %v622_v42 = vmax.f32 %v584_v37, 0.0 }
 0x290   :  { %v586_v9 = vpop.f32.mrf.mxu0 }
 0x291   :  { %v625_v33 = vmax.f32 %v595_v25, 0.0  ;;  %v587_v34 = vadd.f32 %v1455_v11, %v586_v9 }
 0x292   :  { %v1725_v10 = vpop.f32.mrf.mxu0 }
 0x293   :  { %v608_v13 = vadd.f32 %v1725_v10, %v1455_v11  ;;  %v635_v39 = vpack.c.bf16 %v625_v33, %v624_v36  ;;  %v623_v40 = vmax.f32 %v587_v34, 0.0  ;;  %v1464_v34 = vld [vmem:[%s2295_s4 + $0x2] ss:$0 sm:$0xff] }
 0x294   :  { %v599_v12 = vpop.f32.mrf.mxu0 }
 0x295   :  { %v600_v22 = vadd.f32 %v1455_v11, %v599_v12  ;;  %v628_v26 = vmax.f32 %v608_v13, 0.0  ;;  %v634_v45 = vpack.c.bf16 %v623_v40, %v622_v42 }
 0x296   :  { %v1726_v16 = vpop.f32.mrf.mxu0 }
 0x297   :  { %v611_v23 = vadd.f32 %v1726_v16, %v1455_v11  ;;  %v626_v30 = vmax.f32 %v600_v22, 0.0 }
 0x298   :  { %v602_v24 = vpop.f32.mrf.mxu0 }
 0x299   :  { %v629_v27 = vmax.f32 %v611_v23, 0.0  ;;  %v603_v28 = vadd.f32 %v1455_v11, %v602_v24 }
 0x29b   :  { %v637_v31 = vpack.c.bf16 %v629_v27, %v628_v26  ;;  %v627_v32 = vmax.f32 %v603_v28, 0.0 }
 0x29d   :  { %v636_v35 = vpack.c.bf16 %v627_v32, %v626_v30  ;;  %1727 = vmatprep.subr.bf16.mxu1 %v637_v31  ;;  %v1946_v30 = vld [vmem:[%s2294_s3 + $0x3c] ss:$24 sps:$4 sm:$0xff]  }
 0x29e   :  { %1728 = vmatpush3.bf16.msra.mxu1 %v637_v31  ;;  %v1947_v31 = vld [vmem:[%s2294_s3 + $0xc] ss:$24 sps:$4 sm:$0xff]  }
 0x29f   :  { %1729 = vmatprep.subr.bf16.mxu1 %v636_v35 }
 0x2a2   :  { %1730 = vmatpush3.bf16.msra.mxu1 %v636_v35 }
 0x2a3   :  { %1731 = vmatprep.subr.bf16.mxu1 %v635_v39 }
 0x2a6   :  { %1732 = vmatpush3.bf16.msra.mxu1 %v635_v39 }
 0x2a7   :  { %1733 = vmatprep.subr.bf16.mxu1 %v634_v45 }
 0x2aa   :  { %1734 = vmatpush3.bf16.msra.mxu1 %v634_v45 }
 0x2ab   :  { %1735 = vmatprep.subr.bf16.mxu1 %v633_v49 }
 0x2ae   :  { %1736 = vmatpush3.bf16.msra.mxu1 %v633_v49 }
 0x2af   :  { %1737 = vmatprep.subr.bf16.mxu1 %v632_v55 }
 0x2b2   :  { %1738 = vmatpush3.bf16.msra.mxu1 %v632_v55 }
 0x2b3   :  { %1739 = vmatprep.subr.bf16.mxu1 %v631_v58 }
 0x2b6   :  { %1740 = vmatpush3.bf16.msra.mxu1 %v631_v58 }
 0x2b7   :  { %1741 = vmatprep.subr.bf16.mxu1 %v630_v61 }
 0x2ba   :  { %1742 = vmatpush3.bf16.msra.mxu1 %v630_v61 }
 0x2bd   :  { %1744 = vmatmul.mubr.bf16.vlgmr.msra.gmra.mxu1 %v2048_v14  ;;  %v1939_v14 = vld [vmem:[%s2294_s3 + $0x8] ss:$24 sps:$4 sm:$0xff]  }
 0x2be   :  { %1747 = vmatprep.mubr.bf16.mxu1 %v2053_v15  ;;  %1773 = vmatprep.subr.bf16.mxu0 %v1939_v14  ;;  %v1940_v15 = vld [vmem:[%s2294_s3 + $0x15c] ss:$24 sps:$4 sm:$0xff]  }
 0x2bf   :  { %1774 = vmatpush3.bf16.msra.mxu0 %v1939_v14  ;;  %1791 = vmatprep.subr.bf16.mxu1 %v1940_v15 }
 0x2c0   :  { %1792 = vmatpush3.bf16.msra.mxu1 %v1940_v15 }
 0x2c5   :  { %1748 = vmatmul.mubr.bf16.gmra.mxu1 %v2063_v17  ;;  %v1941_v17 = vld [vmem:[%s2294_s3 + $0x12c] ss:$24 sps:$4 sm:$0xff]  }
 0x2c6   :  { %1751 = vmatprep.mubr.bf16.mxu1 %v2068_v18  ;;  %1793 = vmatprep.subr.bf16.mxu1 %v1941_v17  ;;  %v1942_v18 = vld [vmem:[%s2294_s3 + $0xfc] ss:$24 sps:$4 sm:$0xff]  }
 0x2c7   :  { %1794 = vmatpush3.bf16.msra.mxu1 %v1941_v17 }
 0x2c8   :  { %1795 = vmatprep.subr.bf16.mxu1 %v1942_v18 }
 0x2cb   :  { %1796 = vmatpush3.bf16.msra.mxu1 %v1942_v18 }
 0x2cd   :  { %1752 = vmatmul.mubr.bf16.gmra.mxu1 %v2075_v19  ;;  %v1943_v19 = vld [vmem:[%s2294_s3 + $0xcc] ss:$24 sps:$4 sm:$0xff]  }
 0x2ce   :  { %1755 = vmatprep.mubr.bf16.mxu1 %v2080_v20  ;;  %1797 = vmatprep.subr.bf16.mxu1 %v1943_v19  ;;  %v1944_v20 = vld [vmem:[%s2294_s3 + $0x9c] ss:$24 sps:$4 sm:$0xff]  }
 0x2cf   :  { %1798 = vmatpush3.bf16.msra.mxu1 %v1943_v19 }
 0x2d0   :  { %1799 = vmatprep.subr.bf16.mxu1 %v1944_v20 }
 0x2d3   :  { %1800 = vmatpush3.bf16.msra.mxu1 %v1944_v20 }
 0x2d4   :  { %1801 = vmatprep.subr.bf16.mxu1 %v1945_v29 }
 0x2d5   :  { %1756 = vmatmul.mubr.bf16.gmra.mxu1 %v2087_v21 }
 0x2d7   :  { %1802 = vmatpush3.bf16.msra.mxu1 %v1945_v29  ;;  %v1951_v29 = vld [vmem:[%s2294_s3 + $0xd0] ss:$24 sps:$4 sm:$0xff]  }
 0x2d8   :  { %1803 = vmatprep.subr.bf16.mxu1 %v1946_v30 }
 0x2db   :  { %1804 = vmatpush3.bf16.msra.mxu1 %v1946_v30  ;;  %v1952_v30 = vld [vmem:[%s2294_s3 + $0xa0] ss:$24 sps:$4 sm:$0xff]  }
 0x2dc   :  { %1805 = vmatprep.subr.bf16.mxu1 %v1947_v31 }
 0x2df   :  { %1806 = vmatpush3.bf16.msra.mxu1 %v1947_v31  ;;  %v1953_v31 = vld [vmem:[%s2294_s3 + $0x70] ss:$24 sps:$4 sm:$0xff]  }
 0x37d   :  { %v1745_v21 = vpop.f32.mrf.mxu1 }
 0x37f   :  { %v672_v63 = vpop.f32.mrf.mxu1 }
 0x381   :  { %v1746_v0 = vpop.f32.mrf.mxu1 }
 0x382   :  { %v753_v3 = vpack.c.bf16 %v1746_v0, %v1745_v21 }
 0x383   :  { %v675_v1 = vpop.f32.mrf.mxu1 }
 0x384   :  { %v752_v2 = vpack.c.bf16 %v675_v1, %v672_v63 }
 0x385   :  { %v1749_v4 = vpop.f32.mrf.mxu1 }
 0x386   :  { %1775 = vmatprep.mubr.bf16.mxu0 %v752_v2 }
 0x387   :  { %v688_v5 = vpop.f32.mrf.mxu1  ;;  %1776 = vmatmul.mubr.bf16.vlgmr.msra.gmra.mxu0 %v753_v3 }
 0x389   :  { %v1750_v6 = vpop.f32.mrf.mxu1 }
 0x38a   :  { %v755_v9 = vpack.c.bf16 %v1750_v6, %v1749_v4 }
 0x38b   :  { %v691_v7 = vpop.f32.mrf.mxu1 }
 0x38c   :  { %v754_v8 = vpack.c.bf16 %v691_v7, %v688_v5 }
 0x38d   :  { %v1753_v10 = vpop.f32.mrf.mxu1 }
 0x38e   :  { %1779 = vmatprep.mubr.bf16.mxu0 %v754_v8 }
 0x38f   :  { %v704_v11 = vpop.f32.mrf.mxu1  ;;  %1780 = vmatmul.mubr.bf16.gmra.mxu0 %v755_v9 }
 0x391   :  { %v1754_v12 = vpop.f32.mrf.mxu1 }
 0x392   :  { %v757_v22 = vpack.c.bf16 %v1754_v12, %v1753_v10 }
 0x393   :  { %v707_v13 = vpop.f32.mrf.mxu1 }
 0x394   :  { %v756_v16 = vpack.c.bf16 %v707_v13, %v704_v11 }
 0x395   :  { %v1757_v23 = vpop.f32.mrf.mxu1 }
 0x396   :  { %1783 = vmatprep.mubr.bf16.mxu0 %v756_v16 }
 0x397   :  { %v720_v24 = vpop.f32.mrf.mxu1  ;;  %1784 = vmatmul.mubr.bf16.gmra.mxu0 %v757_v22 }
 0x399   :  { %v1758_v25 = vpop.f32.mrf.mxu1 }
 0x39a   :  { %v759_v28 = vpack.c.bf16 %v1758_v25, %v1757_v23  ;;  %v1968_v25 = vmov 0.0  }
 0x39b   :  { %v723_v26 = vpop.f32.mrf.mxu1  ;;  %1823 = vmatprep.subr.mxu0 %v1968_v25  ;;  %1858 = vmatprep.subr.bf16.mxu1 %v1968_v25 }
 0x39c   :  { %v758_v27 = vpack.c.bf16 %v723_v26, %v720_v24  ;;  %v1948_v26 = vld [vmem:[%s2294_s3 + $0x160] ss:$24 sps:$4 sm:$0xff]  }
 0x39e   :  { %1787 = vmatprep.mubr.bf16.mxu0 %v758_v27  ;;  %v1949_v27 = vld [vmem:[%s2294_s3 + $0x130] ss:$24 sps:$4 sm:$0xff]  }
 0x39f   :  { %1788 = vmatmul.mubr.bf16.gmra.mxu0 %v759_v28  ;;  %v1950_v28 = vld [vmem:[%s2294_s3 + $0x100] ss:$24 sps:$4 sm:$0xff]  }
 0x3a0   :  { %1855 = vmatprep.mubr.msk.f32.mxu0 %vm1969_vm0, %v1968_v25 }
 0x447   :  { %v1777_v32 = vpop.f32.mrf.mxu0 }
 0x448   :  { %v857_v38 = vadd.f32 %v1777_v32, %v1464_v34  ;;  %v1954_v32 = vld [vmem:[%s2294_s3 + $0x40] ss:$24 sps:$4 sm:$0xff]  }
 0x449   :  { %v848_v33 = vpop.f32.mrf.mxu0 }
 0x44a   :  { %v849_v36 = vadd.f32 %v1464_v34, %v848_v33  ;;  %v913_v45 = vmax.f32 %v857_v38, 0.0 }
 0x44b   :  { %v1778_v35 = vpop.f32.mrf.mxu0 }
 0x44c   :  { %v860_v37 = vadd.f32 %v1778_v35, %v1464_v34  ;;  %v911_v43 = vmax.f32 %v849_v36, 0.0 }
 0x44d   :  { %v851_v39 = vpop.f32.mrf.mxu0 }
 0x44e   :  { %v852_v40 = vadd.f32 %v1464_v34, %v851_v39  ;;  %v914_v41 = vmax.f32 %v860_v37, 0.0 }
 0x44f   :  { %v1781_v42 = vpop.f32.mrf.mxu0 }
 0x450   :  { %v912_v44 = vmax.f32 %v852_v40, 0.0  ;;  %v945_v48 = vpack.c.bf16 %v914_v41, %v913_v45  ;;  %v873_v52 = vadd.f32 %v1781_v42, %v1464_v34 }
 0x451   :  { %v864_v46 = vpop.f32.mrf.mxu0 }
 0x452   :  { %v944_v47 = vpack.c.bf16 %v912_v44, %v911_v43  ;;  %v865_v50 = vadd.f32 %v1464_v34, %v864_v46  ;;  %v917_v59 = vmax.f32 %v873_v52, 0.0 }
 0x453   :  { %v1782_v49 = vpop.f32.mrf.mxu0 }
 0x454   :  { %v876_v51 = vadd.f32 %v1782_v49, %v1464_v34  ;;  %1807 = vmatprep.mubr.bf16.mxu1 %v944_v47  ;;  %v915_v57 = vmax.f32 %v865_v50, 0.0  ;;  %v1473_v47 = vld [vmem:[%s2295_s4 + $0x3] ss:$0 sm:$0xff] }
 0x455   :  { %v867_v53 = vpop.f32.mrf.mxu0  ;;  %1808 = vmatmul.mubr.bf16.vlgmr.msra.gmra.mxu1 %v945_v48 }
 0x456   :  { %v868_v54 = vadd.f32 %v1464_v34, %v867_v53  ;;  %v918_v55 = vmax.f32 %v876_v51, 0.0  ;;  %1859 = vmatpush3.bf16.msra.mxu1 %v1948_v26  ;;  %v1961_v26 = vld [vmem:[%s2294_s3 + $0x74] ss:$24 sps:$4 sm:$0xff]  }
 0x457   :  { %v1785_v56 = vpop.f32.mrf.mxu0  ;;  %1860 = vmatprep.subr.bf16.mxu1 %v1968_v25 }
 0x458   :  { %v916_v58 = vmax.f32 %v868_v54, 0.0  ;;  %v947_v62 = vpack.c.bf16 %v918_v55, %v917_v59  ;;  %v889_v18 = vadd.f32 %v1785_v56, %v1464_v34 }
 0x459   :  { %v880_v60 = vpop.f32.mrf.mxu0 }
 0x45a   :  { %v946_v61 = vpack.c.bf16 %v916_v58, %v915_v57  ;;  %v881_v15 = vadd.f32 %v1464_v34, %v880_v60  ;;  %v921_v2 = vmax.f32 %v889_v18, 0.0  ;;  %1861 = vmatpush3.bf16.msra.mxu1 %v1949_v27 }
 0x45b   :  { %v1786_v14 = vpop.f32.mrf.mxu0  ;;  %1862 = vmatprep.subr.bf16.mxu1 %v1968_v25 }
 0x45c   :  { %v892_v17 = vadd.f32 %v1786_v14, %v1464_v34  ;;  %1811 = vmatprep.mubr.bf16.mxu1 %v946_v61  ;;  %v919_v0 = vmax.f32 %v881_v15, 0.0 }
 0x45d   :  { %v883_v19 = vpop.f32.mrf.mxu0  ;;  %1812 = vmatmul.mubr.bf16.gmra.mxu1 %v947_v62 }
 0x45e   :  { %v884_v20 = vadd.f32 %v1464_v34, %v883_v19  ;;  %v922_v21 = vmax.f32 %v892_v17, 0.0  ;;  %1863 = vmatpush3.bf16.msra.mxu1 %v1950_v28 }
 0x45f   :  { %v1789_v63 = vpop.f32.mrf.mxu0  ;;  %1864 = vmatprep.subr.bf16.mxu1 %v1968_v25 }
 0x460   :  { %v920_v1 = vmax.f32 %v884_v20, 0.0  ;;  %v949_v5 = vpack.c.bf16 %v922_v21, %v921_v2  ;;  %v905_v9 = vadd.f32 %v1789_v63, %v1464_v34 }
 0x461   :  { %v896_v3 = vpop.f32.mrf.mxu0 }
 0x462   :  { %v948_v4 = vpack.c.bf16 %v920_v1, %v919_v0  ;;  %v897_v7 = vadd.f32 %v1464_v34, %v896_v3  ;;  %v925_v22 = vmax.f32 %v905_v9, 0.0  ;;  %1865 = vmatpush3.bf16.msra.mxu1 %v1951_v29 }
 0x463   :  { %v1790_v6 = vpop.f32.mrf.mxu0  ;;  %1866 = vmatprep.subr.bf16.mxu1 %v1968_v25 }
 0x464   :  { %v908_v8 = vadd.f32 %v1790_v6, %v1464_v34  ;;  %1815 = vmatprep.mubr.bf16.mxu1 %v948_v4  ;;  %v923_v13 = vmax.f32 %v897_v7, 0.0 }
 0x465   :  { %v899_v10 = vpop.f32.mrf.mxu0  ;;  %1816 = vmatmul.mubr.bf16.gmra.mxu1 %v949_v5 }
 0x466   :  { %v900_v11 = vadd.f32 %v1464_v34, %v899_v10  ;;  %v926_v12 = vmax.f32 %v908_v8, 0.0  ;;  %1867 = vmatpush3.bf16.msra.mxu1 %v1952_v30  ;;  %v1962_v30 = vld [vmem:[%s2294_s3 + $0x44] ss:$24 sps:$4 sm:$0xff]  }
 0x467   :  { %1868 = vmatprep.subr.bf16.mxu1 %v1968_v25 }
 0x468   :  { %v924_v16 = vmax.f32 %v900_v11, 0.0  ;;  %v951_v24 = vpack.c.bf16 %v926_v12, %v925_v22  ;;  %v1119_v11 = vld [vmem:[%s2296_s2] sm:$0xff]  ;;  %v1955_v12 = vld [vmem:[%s2294_s3 + $0x10] ss:$24 sps:$4 sm:$0xff]  }
 0x469   :  { %v1958_v22 = vld [vmem:[%s2294_s3 + $0x104] ss:$24 sps:$4 sm:$0xff]  }
 0x46a   :  { %v950_v23 = vpack.c.bf16 %v924_v16, %v923_v13  ;;  %1869 = vmatpush3.bf16.msra.mxu1 %v1953_v31  ;;  %v1956_v13 = vld [vmem:[%s2294_s3 + $0x164] ss:$24 sps:$4 sm:$0xff]   ;;  %v1957_v16 = vld [vmem:[%s2294_s3 + $0x134] ss:$24 sps:$4 sm:$0xff]  }
 0x46b   :  { %1870 = vmatprep.subr.bf16.mxu1 %v1968_v25  ;;  %v1963_v31 = vld [vmem:[%s2294_s3 + $0x14] ss:$24 sps:$4 sm:$0xff]  }
 0x46c   :  { %1819 = vmatprep.mubr.bf16.mxu1 %v950_v23  ;;  %v1959_v23 = vld [vmem:[%s2294_s3 + $0xd4] ss:$24 sps:$4 sm:$0xff]  }
 0x46d   :  { %1820 = vmatmul.mubr.bf16.gmra.mxu1 %v951_v24  ;;  %v1960_v24 = vld [vmem:[%s2294_s3 + $0xa4] ss:$24 sps:$4 sm:$0xff]  }
 0x46e   :  { %1874 = vmatprep.mubr.msk.bf16.mxu1 %vm1969_vm0, %v1968_v25  ;;  %1871 = vmatpush3.bf16.msra.mxu1 %v1954_v32  ;;  %v1482_v32 = vld [vmem:[%s2295_s4 + $0x4] ss:$0 sm:$0xff] }
 0x46f   :  { %1872 = vmatprep.subr.bf16.mxu1 %v1968_v25 }
 0x472   :  { %1873 = vmatpush3.bf16.msra.mxu1 %v1955_v12 }
 0x515   :  { %v1809_v33 = vpop.f32.mrf.mxu1 }
 0x516   :  { %v1049_v3 = vadd.f32 %v1809_v33, %v1473_v47 }
 0x517   :  { %v2219_v34 = vpop.f32.mrf.mxu1 }
 0x518   :  { %v1105_v7 = vmax.f32 %v1049_v3, 0.0  ;;  %v1041_v8 = vadd.f32 %v1473_v47, %v2219_v34 }
 0x519   :  { %v1810_v35 = vpop.f32.mrf.mxu1 }
 0x51a   :  { %v1052_v1 = vadd.f32 %v1810_v35, %v1473_v47  ;;  %v1103_v10 = vmax.f32 %v1041_v8, 0.0 }
 0x51b   :  { %v2221_v36 = vpop.f32.mrf.mxu1 }
 0x51c   :  { %v1106_v5 = vmax.f32 %v1052_v1, 0.0  ;;  %v1044_v6 = vadd.f32 %v1473_v47, %v2221_v36 }
 0x51d   :  { %v1813_v37 = vpop.f32.mrf.mxu1 }
 0x51e   :  { %v1065_v18 = vadd.f32 %v1813_v37, %v1473_v47  ;;  %v1104_v9 = vmax.f32 %v1044_v6, 0.0 }
 0x51f   :  { %v1056_v38 = vpop.f32.mrf.mxu1 }
 0x520   :  { %v1109_v63 = vmax.f32 %v1065_v18, 0.0  ;;  %v1057_v0 = vadd.f32 %v1473_v47, %v1056_v38 }
 0x521   :  { %v1814_v39 = vpop.f32.mrf.mxu1 }
 0x522   :  { %v1068_v15 = vadd.f32 %v1814_v39, %v1473_v47  ;;  %v1107_v4 = vmax.f32 %v1057_v0, 0.0 }
 0x523   :  { %v1059_v40 = vpop.f32.mrf.mxu1 }
 0x524   :  { %v1110_v20 = vmax.f32 %v1068_v15, 0.0  ;;  %v1060_v21 = vadd.f32 %v1473_v47, %v1059_v40 }
 0x525   :  { %v1817_v41 = vpop.f32.mrf.mxu1 }
 0x526   :  { %v1081_v58 = vadd.f32 %v1817_v41, %v1473_v47  ;;  %v1108_v2 = vmax.f32 %v1060_v21, 0.0 }
 0x527   :  { %v1072_v42 = vpop.f32.mrf.mxu1 }
 0x528   :  { %v1113_v62 = vmax.f32 %v1081_v58, 0.0  ;;  %v1073_v14 = vadd.f32 %v1473_v47, %v1072_v42 }
 0x529   :  { %v1818_v43 = vpop.f32.mrf.mxu1 }
 0x52a   :  { %v1084_v56 = vadd.f32 %v1818_v43, %v1473_v47  ;;  %v1111_v19 = vmax.f32 %v1073_v14, 0.0 }
 0x52b   :  { %v1075_v44 = vpop.f32.mrf.mxu1 }
 0x52c   :  { %v1114_v60 = vmax.f32 %v1084_v56, 0.0  ;;  %v1076_v61 = vadd.f32 %v1473_v47, %v1075_v44 }
 0x52d   :  { %v1821_v45 = vpop.f32.mrf.mxu1 }
 0x52e   :  { %v1097_v49 = vadd.f32 %v1821_v45, %v1473_v47  ;;  %v1112_v17 = vmax.f32 %v1076_v61, 0.0 }
 0x52f   :  { %v1088_v46 = vpop.f32.mrf.mxu1 }
 0x530   :  { %v1117_v54 = vmax.f32 %v1097_v49, 0.0  ;;  %v1089_v55 = vadd.f32 %v1473_v47, %v1088_v46 }
 0x531   :  { %v1822_v48 = vpop.f32.mrf.mxu1 }
 0x532   :  { %v1100_v50 = vadd.f32 %v1822_v48, %v1473_v47  ;;  %v1115_v59 = vmax.f32 %v1089_v55, 0.0 }
 0x533   :  { %v1091_v51 = vpop.f32.mrf.mxu1 }
 0x534   :  { %v1118_v52 = vmax.f32 %v1100_v50, 0.0  ;;  %v1092_v53 = vadd.f32 %v1473_v47, %v1091_v51 }
 0x536   :  { %1824 = vmatpush3.msra.mxu0 %v1118_v52  ;;  %v1116_v57 = vmax.f32 %v1092_v53, 0.0 }
 0x537   :  { %1825 = vmatprep.subr.mxu0 %v1968_v25 }
 0x538   :  { %1826 = vmatpush3.msra.mxu0 %v1117_v54 }
 0x539   :  { %1827 = vmatprep.subr.mxu0 %v1968_v25 }
 0x53a   :  { %1828 = vmatpush3.msra.mxu0 %v1116_v57 }
 0x53b   :  { %1829 = vmatprep.subr.mxu0 %v1968_v25 }
 0x53c   :  { %1830 = vmatpush3.msra.mxu0 %v1115_v59 }
 0x53d   :  { %1831 = vmatprep.subr.mxu0 %v1968_v25 }
 0x53e   :  { %1832 = vmatpush3.msra.mxu0 %v1114_v60 }
 0x53f   :  { %1833 = vmatprep.subr.mxu0 %v1968_v25 }
 0x540   :  { %1834 = vmatpush3.msra.mxu0 %v1113_v62 }
 0x541   :  { %1835 = vmatprep.subr.mxu0 %v1968_v25 }
 0x542   :  { %1836 = vmatpush3.msra.mxu0 %v1112_v17 }
 0x543   :  { %1837 = vmatprep.subr.mxu0 %v1968_v25 }
 0x544   :  { %1838 = vmatpush3.msra.mxu0 %v1111_v19 }
 0x545   :  { %1839 = vmatprep.subr.mxu0 %v1968_v25 }
 0x546   :  { %1840 = vmatpush3.msra.mxu0 %v1110_v20 }
 0x547   :  { %1841 = vmatprep.subr.mxu0 %v1968_v25 }
 0x548   :  { %1842 = vmatpush3.msra.mxu0 %v1109_v63 }
 0x549   :  { %1843 = vmatprep.subr.mxu0 %v1968_v25 }
 0x54a   :  { %1844 = vmatpush3.msra.mxu0 %v1108_v2 }
 0x54b   :  { %1845 = vmatprep.subr.mxu0 %v1968_v25 }
 0x54c   :  { %1846 = vmatpush3.msra.mxu0 %v1107_v4 }
 0x54d   :  { %1847 = vmatprep.subr.mxu0 %v1968_v25 }
 0x54e   :  { %1848 = vmatpush3.msra.mxu0 %v1106_v5 }
 0x54f   :  { %1849 = vmatprep.subr.mxu0 %v1968_v25 }
 0x550   :  { %1850 = vmatpush3.msra.mxu0 %v1105_v7 }
 0x551   :  { %1851 = vmatprep.subr.mxu0 %v1968_v25 }
 0x552   :  { %1852 = vmatpush3.msra.mxu0 %v1104_v9 }
 0x553   :  { %1853 = vmatprep.subr.mxu0 %v1968_v25 }
 0x554   :  { %1854 = vmatpush3.msra.mxu0 %v1103_v10 }
 0x555   :  { %1856 = vmatmul.mubr.f32.vlgmr.msra.gmra.mxu0 %v1119_v11  ;;  %1878 = vmatprep.subr.bf16.mxu0 %v1968_v25 }
 0x556   :  { %1894 = vmatprep.mubr.msk.bf16.mxu0 %vm1969_vm0, %v1968_v25  ;;  %1879 = vmatpush3.bf16.msra.mxu0 %v1956_v13 }
 0x557   :  { %1880 = vmatprep.subr.bf16.mxu0 %v1968_v25 }
 0x55a   :  { %1881 = vmatpush3.bf16.msra.mxu0 %v1957_v16 }
 0x55b   :  { %1882 = vmatprep.subr.bf16.mxu0 %v1968_v25 }
 0x55e   :  { %1883 = vmatpush3.bf16.msra.mxu0 %v1958_v22 }
 0x55f   :  { %1884 = vmatprep.subr.bf16.mxu0 %v1968_v25 }
 0x562   :  { %1885 = vmatpush3.bf16.msra.mxu0 %v1959_v23 }
 0x563   :  { %1886 = vmatprep.subr.bf16.mxu0 %v1968_v25 }
 0x566   :  { %1887 = vmatpush3.bf16.msra.mxu0 %v1960_v24 }
 0x567   :  { %1888 = vmatprep.subr.bf16.mxu0 %v1968_v25 }
 0x56a   :  { %1889 = vmatpush3.bf16.msra.mxu0 %v1961_v26 }
 0x56b   :  { %1890 = vmatprep.subr.bf16.mxu0 %v1968_v25 }
 0x56e   :  { %1891 = vmatpush3.bf16.msra.mxu0 %v1962_v30 }
 0x56f   :  { %1892 = vmatprep.subr.bf16.mxu0 %v1968_v25  ;;  %v1491_v25 = vld [vmem:[%s2295_s4 + $0x5] ss:$0 sm:$0xff] }
 0x572   :  { %1893 = vmatpush3.bf16.msra.mxu0 %v1963_v31 }
 0x615   :  { %v1186_v27 = vpop.f32.mrf.mxu0 }
 0x616   :  { %v1207_v28 = vpack.c.bf16 %v1186_v27, %v1186_v27 }
 0x617   :  { %v1857_v29 = vpop.f32.mrf.mxu0 }
 0x618   :  { %1875 = vmatmul.mubr.bf16.vlgmr.msra.gmra.mxu1 %v1207_v28 }
 0x6d8   :  { %v1296_v33 = vpop.f32.mrf.mxu1 }
 0x6d9   :  { %v1297_v34 = vadd.f32 %v1482_v32, %v1296_v33 }
 0x6da   :  { %v1876_v35 = vpop.f32.mrf.mxu1 }
 0x6db   :  { %v1302_v36 = vmax.f32 %v1297_v34, 0.0 }
 0x6dc   :  { %v1299_v37 = vpop.f32.mrf.mxu1 }
 0x6dd   :  { %v1320_v38 = vpack.c.bf16 %v1302_v36, %v1302_v36 }
 0x6de   :  { %v1877_v39 = vpop.f32.mrf.mxu1 }
 0x6df   :  { %1895 = vmatmul.mubr.bf16.vlgmr.msra.gmra.mxu0 %v1320_v38 }
 0x79f   :  { %v1409_v40 = vpop.f32.mrf.mxu0 }
 0x7a0   :  { %v1410_v41 = vadd.f32 %v1491_v25, %v1409_v40 }
 0x7a1   :  { %v1896_v42 = vpop.f32.mrf.mxu0 }
 0x7a2   :  { %1415 = vmax.xlane.f32.xlu0 %v1410_v41 }
 0x7a3   :  { %v1412_v43 = vpop.f32.mrf.mxu0 }
 0x7a5   :  { %v1897_v44 = vpop.f32.mrf.mxu0 }
 0x82b   :  { %v1416_v45 = vpop.xlane.xlu0 %1415 }
 0x82c   :  { %v1417_v46 = vsub.f32 %v1410_v41, %v1416_v45 }
 0x82e   :  { %v1418_v47 = vmul.f32 1.442695, %v1417_v46 }
 0x830   :  { %1964 = vpow2.f32 %v1418_v47 }
 0x83d   :  { %v1965_v48 = vpop.eup %1964 }
 0x83e   :  { %1420 = vadd.xlane.f32.xlu0 %v1965_v48 }
 0x8c7   :  { %v1421_v49 = vpop.xlane.xlu0 %1420 }
 0x8c8   :  { %1966 = vlog2.f32 %v1421_v49 }
 0x8d5   :  { %v1967_v50 = vpop.eup %1966 }
 0x8d6   :  { %v1423_v51 = vmul.f32 0.6931472, %v1967_v50 }
 0x8d8   :  { %v1424_v52 = vsub.f32 %v1417_v46, %v1423_v51 }
 0x8da   :  { %1425 = vst [vmem:[%s2297_s5] sm:$0xff] %v1424_v52 }

</bundles_post_ra>
